<compile_context>
chip_gen: v7x
topology: tpu7x:2x2x1
jax: 0.10.0
libtpu: 0.0.40
codegen_flags: <defaults>
</compile_context>

<pallas_src>
import functools

import jax
import jax.numpy as jnp
from jax.experimental import pallas as pl
from jax.experimental.pallas import tpu as pltpu

# ---- module hyper-parameters (deterministic, in-script) ----
OBS_DIM = 3
ACT_DIM = 2
DEGREE = 2
# nn.Linear input dim is obs_dim*degree, which equals the true degree-2 pair
# count C(obs_dim+1, 2) only for obs_dim == 3, so obs_dim = 3 is used.
FEAT_DIM = OBS_DIM * DEGREE
MIN_LOG_STD = -20.0
MAX_LOG_STD = 2.0

# (i <= j) pair ordering of make_features(), degree 2.
PAIRS = [(i, j) for i in range(OBS_DIM) for j in range(i, OBS_DIM)]
assert len(PAIRS) == FEAT_DIM
# TODO(synk): degree=4 feature path of make_features() is not implemented
# (the module default degree=2 is what this kernel covers).


def stocha_policy_kernel(w_ref, aux_ref, x_ref, out_ref):
    """One batch tile, batch-on-lanes layout.

    w_ref   : (2*ACT_DIM, FEAT_DIM)  SMEM  fused [mean | log_std] weights
                                           (w_ref[r, k] = weight of feature k
                                           for output row r)
    aux_ref : (2*ACT_DIM, 3)         SMEM  columns = [bias, (hi-lo)/2, (hi+lo)/2]
    x_ref   : (OBS_DIM, TB)          VMEM  observations, batch on lanes
    out_ref : (2*ACT_DIM, TB)        VMEM  rows [0, ACT_DIM) = mean, rest = std
    """
    # Observation rows loaded once; degree-2 feature rows computed once and
    # shared by all output rows (pure VPU, exact f32).
    xr = [x_ref[i:i + 1, :] for i in range(OBS_DIM)]
    feats = [xr[i] * xr[j] for (i, j) in PAIRS]          # 6 x (1, TB)

    def linear_row(r):
        # SMEM scalars as splat operands: no VMEM column slice / lane-broadcast.
        lin = feats[0] * w_ref[r, 0]
        for k in range(1, FEAT_DIM):
            lin = lin + feats[k] * w_ref[r, k]
        return lin + aux_ref[r, 0]                       # + bias

    # Mean rows: tanh + affine only (exp never evaluated on these rows).
    for r in range(ACT_DIM):
        lin = linear_row(r)
        out_ref[r:r + 1, :] = aux_ref[r, 1] * jnp.tanh(lin) + aux_ref[r, 2]

    # Log-std rows: clip + exp only (tanh never evaluated on these rows).
    for r in range(ACT_DIM, 2 * ACT_DIM):
        lin = linear_row(r)
        out_ref[r:r + 1, :] = jnp.exp(jnp.clip(lin, MIN_LOG_STD, MAX_LOG_STD))


def prepare_params(params):
    """Fuse the two heads once (hoisted out of the per-call forward path).

    Returns:
      w_t : (2*ACT_DIM, FEAT_DIM) f32 fused weights (rows 0..ACT_DIM-1 = mean)
      aux : (2*ACT_DIM, 3)        f32 columns = [bias, (hi-lo)/2, (hi+lo)/2]
    """
    wm, bm, ws, bs, act_high, act_low = params
    w_t = jnp.concatenate([wm, ws], axis=1).T.astype(jnp.float32)    # (2A, F)
    bias = jnp.concatenate([bm, bs], axis=1).reshape(2 * ACT_DIM, 1)
    scale = jnp.concatenate([(act_high - act_low) * 0.5,
                             jnp.ones((1, ACT_DIM), jnp.float32)],
                            axis=1).reshape(2 * ACT_DIM, 1)
    offset = jnp.concatenate([(act_high + act_low) * 0.5,
                              jnp.zeros((1, ACT_DIM), jnp.float32)],
                             axis=1).reshape(2 * ACT_DIM, 1)
    aux = jnp.concatenate([bias, scale, offset], axis=1).astype(jnp.float32)
    return w_t, aux


@functools.partial(jax.jit, static_argnames=("block_b",))
def stocha_policy_forward(obs, w_t, aux, *, block_b=2048):
    """obs: (B, OBS_DIM) -> (B, 2*ACT_DIM) = [action_mean | action_std]."""
    batch = obs.shape[0]
    assert obs.shape[1] == OBS_DIM
    assert block_b % 128 == 0

    # Largest tile <= block_b lanes (128-multiple), but capped so the grid has
    # >= 2 steps whenever the batch allows it (v7x: both TensorCores busy).
    half = pl.cdiv(pl.cdiv(batch, 2), 128) * 128
    tb = max(128, min(block_b, half))
    grid = pl.cdiv(batch, tb)

    # Batch-on-lanes input; no explicit zero-pad — Pallas masks the ragged
    # last tile on writeback, and all epilogue math keeps garbage lanes finite.
    x_t = obs.T.astype(jnp.float32)                      # (OBS_DIM, B)

    out_t = pl.pallas_call(
        stocha_policy_kernel,
        out_shape=jax.ShapeDtypeStruct((2 * ACT_DIM, batch), jnp.float32),
        grid_spec=pltpu.PrefetchScalarGridSpec(
            num_scalar_prefetch=0,
            grid=(grid,),
            in_specs=[
                pl.BlockSpec(memory_space=pltpu.MemorySpace.SMEM),   # w_t
                pl.BlockSpec(memory_space=pltpu.MemorySpace.SMEM),   # aux
                pl.BlockSpec((OBS_DIM, tb), lambda i: (0, i)),
            ],
            out_specs=pl.BlockSpec((2 * ACT_DIM, tb), lambda i: (0, i)),
        ),
        compiler_params=pltpu.CompilerParams(
            dimension_semantics=("parallel",)),
    )(w_t, aux, x_t)

    # Transpose back to the module's (B, 2*ACT_DIM) layout; inside the same
    # jit so XLA fuses it with the surrounding layout plumbing.
    return out_t.T


def _reference_forward(obs, params):
    """Pure-JAX reference mirroring the PyTorch forward (natural layout)."""
    wm, bm, ws, bs, hi, lo = params
    cols = [obs[:, i] * obs[:, j] for (i, j) in PAIRS]
    feats = jnp.stack(cols, axis=1)                              # (B, FEAT_DIM)
    mean_lin = jnp.dot(feats, wm, precision=jax.lax.Precision.HIGHEST) + bm
    logstd_lin = jnp.dot(feats, ws, precision=jax.lax.Precision.HIGHEST) + bs
    a_mean = (hi - lo) / 2 * jnp.tanh(mean_lin) + (hi + lo) / 2
    a_std = jnp.exp(jnp.clip(logstd_lin, MIN_LOG_STD, MAX_LOG_STD))
    return jnp.concatenate([a_mean, a_std], axis=-1)


if __name__ == "__main__":
    key = jax.random.PRNGKey(0)
    k_obs, k_obs2, k_wm, k_bm, k_ws, k_bs = jax.random.split(key, 6)

    # deterministic synthetic parameters (matches torch nn.Linear init range)
    bound = 1.0 / (FEAT_DIM ** 0.5)
    wm = jax.random.uniform(k_wm, (FEAT_DIM, ACT_DIM), jnp.float32, -bound, bound)
    bm = jax.random.uniform(k_bm, (1, ACT_DIM), jnp.float32, -bound, bound)
    ws = jax.random.uniform(k_ws, (FEAT_DIM, ACT_DIM), jnp.float32, -bound, bound)
    bs = jax.random.uniform(k_bs, (1, ACT_DIM), jnp.float32, -bound, bound)
    act_high = jnp.full((1, ACT_DIM), 2.0, dtype=jnp.float32)
    act_low = jnp.full((1, ACT_DIM), -2.0, dtype=jnp.float32)
    params = (wm, bm, ws, bs, act_high, act_low)

    # head fusion done once, outside the forward path
    w_t, aux = jax.block_until_ready(prepare_params(params))

    # small demo batch (single 128-lane partial tile, no host-side padding)
    obs = jax.random.normal(k_obs, (8, OBS_DIM), dtype=jnp.float32)
    out = jax.block_until_ready(stocha_policy_forward(obs, w_t, aux))
    ref = _reference_forward(obs, params)
    assert out.shape == (8, 2 * ACT_DIM)
    assert jnp.allclose(out, ref, atol=1e-4, rtol=1e-5), "mismatch vs reference (B=8)"

    # ragged multi-tile grid: 2 grid steps (v7x path), masked tail lanes
    obs2 = jax.random.normal(k_obs2, (333, OBS_DIM), dtype=jnp.float32)
    out2 = jax.block_until_ready(stocha_policy_forward(obs2, w_t, aux))
    ref2 = _reference_forward(obs2, params)
    assert out2.shape == (333, 2 * ACT_DIM)
    assert jnp.allclose(out2, ref2, atol=1e-4, rtol=1e-5), "mismatch vs reference (B=333)"

    print("KERNEL_OK")
</pallas_src>

<mosaic_0001>
module attributes {stable_mosaic.version = 11 : i64} {
  func.func @stocha_policy_kernel(%arg0: i32, %arg1: memref<4x6xf32, #tpu.memory_space<smem>>, %arg2: memref<4x3xf32, #tpu.memory_space<smem>>, %arg3: memref<3x128xf32, #tpu.memory_space<vmem>>, %arg4: memref<4x128xf32, #tpu.memory_space<vmem>>) attributes {dimension_semantics = [#tpu.dimension_semantics<parallel>], iteration_bounds = array<i64: 1>, scalar_prefetch = 0 : i64, scratch_operands = 0 : i64, tpu.core_type = #tpu.core_type<tc>, window_params = [{transform_indices = @transform_0, window_bounds = array<i64: 4, 6>}, {transform_indices = @transform_1, window_bounds = array<i64: 4, 3>}, {transform_indices = @transform_2, window_bounds = array<i64: 3, 128>}, {transform_indices = @transform_3, window_bounds = array<i64: 4, 128>}]} {
    %c0 = arith.constant 0 : index
    %c0_0 = arith.constant 0 : index
    %0 = vector.load %arg3[%c0, %c0_0] : memref<3x128xf32, #tpu.memory_space<vmem>>, vector<1x128xf32>
    %c1 = arith.constant 1 : index
    %c0_1 = arith.constant 0 : index
    %1 = vector.load %arg3[%c1, %c0_1] : memref<3x128xf32, #tpu.memory_space<vmem>>, vector<1x128xf32>
    %c2 = arith.constant 2 : index
    %c0_2 = arith.constant 0 : index
    %2 = vector.load %arg3[%c2, %c0_2] : memref<3x128xf32, #tpu.memory_space<vmem>>, vector<1x128xf32>
    %3 = arith.mulf %0, %0 : vector<1x128xf32>
    %4 = arith.mulf %0, %1 : vector<1x128xf32>
    %5 = arith.mulf %0, %2 : vector<1x128xf32>
    %6 = arith.mulf %1, %1 : vector<1x128xf32>
    %7 = arith.mulf %1, %2 : vector<1x128xf32>
    %8 = arith.mulf %2, %2 : vector<1x128xf32>
    %c0_3 = arith.constant 0 : index
    %c0_4 = arith.constant 0 : index
    %9 = memref.load %arg1[%c0_3, %c0_4] : memref<4x6xf32, #tpu.memory_space<smem>>
    %10 = vector.broadcast %9 : f32 to vector<1x128xf32>
    %11 = arith.mulf %3, %10 : vector<1x128xf32>
    %c0_5 = arith.constant 0 : index
    %c1_6 = arith.constant 1 : index
    %12 = memref.load %arg1[%c0_5, %c1_6] : memref<4x6xf32, #tpu.memory_space<smem>>
    %13 = vector.broadcast %12 : f32 to vector<1x128xf32>
    %14 = arith.mulf %4, %13 : vector<1x128xf32>
    %15 = arith.addf %11, %14 : vector<1x128xf32>
    %c0_7 = arith.constant 0 : index
    %c2_8 = arith.constant 2 : index
    %16 = memref.load %arg1[%c0_7, %c2_8] : memref<4x6xf32, #tpu.memory_space<smem>>
    %17 = vector.broadcast %16 : f32 to vector<1x128xf32>
    %18 = arith.mulf %5, %17 : vector<1x128xf32>
    %19 = arith.addf %15, %18 : vector<1x128xf32>
    %c0_9 = arith.constant 0 : index
    %c3 = arith.constant 3 : index
    %20 = memref.load %arg1[%c0_9, %c3] : memref<4x6xf32, #tpu.memory_space<smem>>
    %21 = vector.broadcast %20 : f32 to vector<1x128xf32>
    %22 = arith.mulf %6, %21 : vector<1x128xf32>
    %23 = arith.addf %19, %22 : vector<1x128xf32>
    %c0_10 = arith.constant 0 : index
    %c4 = arith.constant 4 : index
    %24 = memref.load %arg1[%c0_10, %c4] : memref<4x6xf32, #tpu.memory_space<smem>>
    %25 = vector.broadcast %24 : f32 to vector<1x128xf32>
    %26 = arith.mulf %7, %25 : vector<1x128xf32>
    %27 = arith.addf %23, %26 : vector<1x128xf32>
    %c0_11 = arith.constant 0 : index
    %c5 = arith.constant 5 : index
    %28 = memref.load %arg1[%c0_11, %c5] : memref<4x6xf32, #tpu.memory_space<smem>>
    %29 = vector.broadcast %28 : f32 to vector<1x128xf32>
    %30 = arith.mulf %8, %29 : vector<1x128xf32>
    %31 = arith.addf %27, %30 : vector<1x128xf32>
    %c0_12 = arith.constant 0 : index
    %c0_13 = arith.constant 0 : index
    %32 = memref.load %arg2[%c0_12, %c0_13] : memref<4x3xf32, #tpu.memory_space<smem>>
    %33 = vector.broadcast %32 : f32 to vector<1x128xf32>
    %34 = arith.addf %31, %33 : vector<1x128xf32>
    %c0_14 = arith.constant 0 : index
    %c1_15 = arith.constant 1 : index
    %35 = memref.load %arg2[%c0_14, %c1_15] : memref<4x3xf32, #tpu.memory_space<smem>>
    %36 = math.tanh %34 : vector<1x128xf32>
    %37 = vector.broadcast %35 : f32 to vector<1x128xf32>
    %38 = arith.mulf %37, %36 : vector<1x128xf32>
    %c0_16 = arith.constant 0 : index
    %c2_17 = arith.constant 2 : index
    %39 = memref.load %arg2[%c0_16, %c2_17] : memref<4x3xf32, #tpu.memory_space<smem>>
    %40 = vector.broadcast %39 : f32 to vector<1x128xf32>
    %41 = arith.addf %38, %40 : vector<1x128xf32>
    %c0_18 = arith.constant 0 : index
    %c0_19 = arith.constant 0 : index
    %42 = vector.load %arg4[%c0_18, %c0_19] : memref<4x128xf32, #tpu.memory_space<vmem>>, vector<1x128xf32>
    tpu.vector_store %arg4[%c0_18, %c0_19], %41 {strides = array<i32>} : memref<4x128xf32, #tpu.memory_space<vmem>>, vector<1x128xf32>,
    %c1_20 = arith.constant 1 : index
    %c0_21 = arith.constant 0 : index
    %43 = memref.load %arg1[%c1_20, %c0_21] : memref<4x6xf32, #tpu.memory_space<smem>>
    %44 = vector.broadcast %43 : f32 to vector<1x128xf32>
    %45 = arith.mulf %3, %44 : vector<1x128xf32>
    %c1_22 = arith.constant 1 : index
    %c1_23 = arith.constant 1 : index
    %46 = memref.load %arg1[%c1_22, %c1_23] : memref<4x6xf32, #tpu.memory_space<smem>>
    %47 = vector.broadcast %46 : f32 to vector<1x128xf32>
    %48 = arith.mulf %4, %47 : vector<1x128xf32>
    %49 = arith.addf %45, %48 : vector<1x128xf32>
    %c1_24 = arith.constant 1 : index
    %c2_25 = arith.constant 2 : index
    %50 = memref.load %arg1[%c1_24, %c2_25] : memref<4x6xf32, #tpu.memory_space<smem>>
    %51 = vector.broadcast %50 : f32 to vector<1x128xf32>
    %52 = arith.mulf %5, %51 : vector<1x128xf32>
    %53 = arith.addf %49, %52 : vector<1x128xf32>
    %c1_26 = arith.constant 1 : index
    %c3_27 = arith.constant 3 : index
    %54 = memref.load %arg1[%c1_26, %c3_27] : memref<4x6xf32, #tpu.memory_space<smem>>
    %55 = vector.broadcast %54 : f32 to vector<1x128xf32>
    %56 = arith.mulf %6, %55 : vector<1x128xf32>
    %57 = arith.addf %53, %56 : vector<1x128xf32>
    %c1_28 = arith.constant 1 : index
    %c4_29 = arith.constant 4 : index
    %58 = memref.load %arg1[%c1_28, %c4_29] : memref<4x6xf32, #tpu.memory_space<smem>>
    %59 = vector.broadcast %58 : f32 to vector<1x128xf32>
    %60 = arith.mulf %7, %59 : vector<1x128xf32>
    %61 = arith.addf %57, %60 : vector<1x128xf32>
    %c1_30 = arith.constant 1 : index
    %c5_31 = arith.constant 5 : index
    %62 = memref.load %arg1[%c1_30, %c5_31] : memref<4x6xf32, #tpu.memory_space<smem>>
    %63 = vector.broadcast %62 : f32 to vector<1x128xf32>
    %64 = arith.mulf %8, %63 : vector<1x128xf32>
    %65 = arith.addf %61, %64 : vector<1x128xf32>
    %c1_32 = arith.constant 1 : index
    %c0_33 = arith.constant 0 : index
    %66 = memref.load %arg2[%c1_32, %c0_33] : memref<4x3xf32, #tpu.memory_space<smem>>
    %67 = vector.broadcast %66 : f32 to vector<1x128xf32>
    %68 = arith.addf %65, %67 : vector<1x128xf32>
    %c1_34 = arith.constant 1 : index
    %c1_35 = arith.constant 1 : index
    %69 = memref.load %arg2[%c1_34, %c1_35] : memref<4x3xf32, #tpu.memory_space<smem>>
    %70 = math.tanh %68 : vector<1x128xf32>
    %71 = vector.broadcast %69 : f32 to vector<1x128xf32>
    %72 = arith.mulf %71, %70 : vector<1x128xf32>
    %c1_36 = arith.constant 1 : index
    %c2_37 = arith.constant 2 : index
    %73 = memref.load %arg2[%c1_36, %c2_37] : memref<4x3xf32, #tpu.memory_space<smem>>
    %74 = vector.broadcast %73 : f32 to vector<1x128xf32>
    %75 = arith.addf %72, %74 : vector<1x128xf32>
    %c1_38 = arith.constant 1 : index
    %c0_39 = arith.constant 0 : index
    %76 = vector.load %arg4[%c1_38, %c0_39] : memref<4x128xf32, #tpu.memory_space<vmem>>, vector<1x128xf32>
    tpu.vector_store %arg4[%c1_38, %c0_39], %75 {strides = array<i32>} : memref<4x128xf32, #tpu.memory_space<vmem>>, vector<1x128xf32>,
    %c2_40 = arith.constant 2 : index
    %c0_41 = arith.constant 0 : index
    %77 = memref.load %arg1[%c2_40, %c0_41] : memref<4x6xf32, #tpu.memory_space<smem>>
    %78 = vector.broadcast %77 : f32 to vector<1x128xf32>
    %79 = arith.mulf %3, %78 : vector<1x128xf32>
    %c2_42 = arith.constant 2 : index
    %c1_43 = arith.constant 1 : index
    %80 = memref.load %arg1[%c2_42, %c1_43] : memref<4x6xf32, #tpu.memory_space<smem>>
    %81 = vector.broadcast %80 : f32 to vector<1x128xf32>
    %82 = arith.mulf %4, %81 : vector<1x128xf32>
    %83 = arith.addf %79, %82 : vector<1x128xf32>
    %c2_44 = arith.constant 2 : index
    %c2_45 = arith.constant 2 : index
    %84 = memref.load %arg1[%c2_44, %c2_45] : memref<4x6xf32, #tpu.memory_space<smem>>
    %85 = vector.broadcast %84 : f32 to vector<1x128xf32>
    %86 = arith.mulf %5, %85 : vector<1x128xf32>
    %87 = arith.addf %83, %86 : vector<1x128xf32>
    %c2_46 = arith.constant 2 : index
    %c3_47 = arith.constant 3 : index
    %88 = memref.load %arg1[%c2_46, %c3_47] : memref<4x6xf32, #tpu.memory_space<smem>>
    %89 = vector.broadcast %88 : f32 to vector<1x128xf32>
    %90 = arith.mulf %6, %89 : vector<1x128xf32>
    %91 = arith.addf %87, %90 : vector<1x128xf32>
    %c2_48 = arith.constant 2 : index
    %c4_49 = arith.constant 4 : index
    %92 = memref.load %arg1[%c2_48, %c4_49] : memref<4x6xf32, #tpu.memory_space<smem>>
    %93 = vector.broadcast %92 : f32 to vector<1x128xf32>
    %94 = arith.mulf %7, %93 : vector<1x128xf32>
    %95 = arith.addf %91, %94 : vector<1x128xf32>
    %c2_50 = arith.constant 2 : index
    %c5_51 = arith.constant 5 : index
    %96 = memref.load %arg1[%c2_50, %c5_51] : memref<4x6xf32, #tpu.memory_space<smem>>
    %97 = vector.broadcast %96 : f32 to vector<1x128xf32>
    %98 = arith.mulf %8, %97 : vector<1x128xf32>
    %99 = arith.addf %95, %98 : vector<1x128xf32>
    %c2_52 = arith.constant 2 : index
    %c0_53 = arith.constant 0 : index
    %100 = memref.load %arg2[%c2_52, %c0_53] : memref<4x3xf32, #tpu.memory_space<smem>>
    %101 = vector.broadcast %100 : f32 to vector<1x128xf32>
    %102 = arith.addf %99, %101 : vector<1x128xf32>
    %cst = arith.constant -2.000000e+01 : f32
    %cst_54 = arith.constant 2.000000e+00 : f32
    %103 = vector.broadcast %cst : f32 to vector<1x128xf32>
    %104 = arith.maximumf %103, %102 : vector<1x128xf32>
    %105 = vector.broadcast %cst_54 : f32 to vector<1x128xf32>
    %106 = arith.minimumf %105, %104 : vector<1x128xf32>
    %107 = math.exp %106 : vector<1x128xf32>
    %c2_55 = arith.constant 2 : index
    %c0_56 = arith.constant 0 : index
    %108 = vector.load %arg4[%c2_55, %c0_56] : memref<4x128xf32, #tpu.memory_space<vmem>>, vector<1x128xf32>
    tpu.vector_store %arg4[%c2_55, %c0_56], %107 {strides = array<i32>} : memref<4x128xf32, #tpu.memory_space<vmem>>, vector<1x128xf32>,
    %c3_57 = arith.constant 3 : index
    %c0_58 = arith.constant 0 : index
    %109 = memref.load %arg1[%c3_57, %c0_58] : memref<4x6xf32, #tpu.memory_space<smem>>
    %110 = vector.broadcast %109 : f32 to vector<1x128xf32>
    %111 = arith.mulf %3, %110 : vector<1x128xf32>
    %c3_59 = arith.constant 3 : index
    %c1_60 = arith.constant 1 : index
    %112 = memref.load %arg1[%c3_59, %c1_60] : memref<4x6xf32, #tpu.memory_space<smem>>
    %113 = vector.broadcast %112 : f32 to vector<1x128xf32>
    %114 = arith.mulf %4, %113 : vector<1x128xf32>
    %115 = arith.addf %111, %114 : vector<1x128xf32>
    %c3_61 = arith.constant 3 : index
    %c2_62 = arith.constant 2 : index
    %116 = memref.load %arg1[%c3_61, %c2_62] : memref<4x6xf32, #tpu.memory_space<smem>>
    %117 = vector.broadcast %116 : f32 to vector<1x128xf32>
    %118 = arith.mulf %5, %117 : vector<1x128xf32>
    %119 = arith.addf %115, %118 : vector<1x128xf32>
    %c3_63 = arith.constant 3 : index
    %c3_64 = arith.constant 3 : index
    %120 = memref.load %arg1[%c3_63, %c3_64] : memref<4x6xf32, #tpu.memory_space<smem>>
    %121 = vector.broadcast %120 : f32 to vector<1x128xf32>
    %122 = arith.mulf %6, %121 : vector<1x128xf32>
    %123 = arith.addf %119, %122 : vector<1x128xf32>
    %c3_65 = arith.constant 3 : index
    %c4_66 = arith.constant 4 : index
    %124 = memref.load %arg1[%c3_65, %c4_66] : memref<4x6xf32, #tpu.memory_space<smem>>
    %125 = vector.broadcast %124 : f32 to vector<1x128xf32>
    %126 = arith.mulf %7, %125 : vector<1x128xf32>
    %127 = arith.addf %123, %126 : vector<1x128xf32>
    %c3_67 = arith.constant 3 : index
    %c5_68 = arith.constant 5 : index
    %128 = memref.load %arg1[%c3_67, %c5_68] : memref<4x6xf32, #tpu.memory_space<smem>>
    %129 = vector.broadcast %128 : f32 to vector<1x128xf32>
    %130 = arith.mulf %8, %129 : vector<1x128xf32>
    %131 = arith.addf %127, %130 : vector<1x128xf32>
    %c3_69 = arith.constant 3 : index
    %c0_70 = arith.constant 0 : index
    %132 = memref.load %arg2[%c3_69, %c0_70] : memref<4x3xf32, #tpu.memory_space<smem>>
    %133 = vector.broadcast %132 : f32 to vector<1x128xf32>
    %134 = arith.addf %131, %133 : vector<1x128xf32>
    %cst_71 = arith.constant -2.000000e+01 : f32
    %cst_72 = arith.constant 2.000000e+00 : f32
    %135 = vector.broadcast %cst_71 : f32 to vector<1x128xf32>
    %136 = arith.maximumf %135, %134 : vector<1x128xf32>
    %137 = vector.broadcast %cst_72 : f32 to vector<1x128xf32>
    %138 = arith.minimumf %137, %136 : vector<1x128xf32>
    %139 = math.exp %138 : vector<1x128xf32>
    %c3_73 = arith.constant 3 : index
    %c0_74 = arith.constant 0 : index
    %140 = vector.load %arg4[%c3_73, %c0_74] : memref<4x128xf32, #tpu.memory_space<vmem>>, vector<1x128xf32>
    tpu.vector_store %arg4[%c3_73, %c0_74], %139 {strides = array<i32>} : memref<4x128xf32, #tpu.memory_space<vmem>>, vector<1x128xf32>,
    return
  }
  func.func @transform_0(%arg0: i32) -> (i32, i32) {
    %c0_i32 = arith.constant 0 : i32
    %c0_i32_0 = arith.constant 0 : i32
    %c0_i32_1 = arith.constant 0 : i32
    return %c0_i32, %c0_i32_0 : i32, i32
  }
  func.func @transform_1(%arg0: i32) -> (i32, i32) {
    %c0_i32 = arith.constant 0 : i32
    %c0_i32_0 = arith.constant 0 : i32
    %c0_i32_1 = arith.constant 0 : i32
    return %c0_i32, %c0_i32_0 : i32, i32
  }
  func.func @transform_2(%arg0: i32) -> (i32, i32) {
    %c0_i32 = arith.constant 0 : i32
    %c0_i32_0 = arith.constant 0 : i32
    return %c0_i32, %arg0 : i32, i32
  }
  func.func @transform_3(%arg0: i32) -> (i32, i32) {
    %c0_i32 = arith.constant 0 : i32
    %c0_i32_0 = arith.constant 0 : i32
    return %c0_i32, %arg0 : i32, i32
  }
}

</mosaic_0001>

<bundles_post_ra>
// kernel: stocha_policy_forward.1
= control target key start
LH: loop header
LB: loop body
LE: loop exit
PB: predicated region body
PF: predicated region fallthrough
CT: control target
= control target key end

     0   :  { %8 = vsyncpa [#allocation5], 0  ;;  %s485_s0 = inlined_call_operand.vmem [shape: f32[4,6], index: 0, kind: input, shape index: {}]   ;;  %s486_s1 = inlined_call_operand.vmem [shape: f32[4,3], index: 1, kind: input, shape index: {}]   ;;  %s487_s2 = inlined_call_operand.hbm [shape: f32[3,8], index: 2, kind: input, shape index: {}]   ;;  %s488_s3 = inlined_call_operand.hbm [shape: f32[4,8], index: 3, kind: output, shape index: {}]  }
   0x1   :  { %9 = vsyncpa [#allocation7], 0 }
   0x2   :  { %10 = vsyncpa [#allocation3], 0 }
   0x3   :  { %11 = vsyncpa [#allocation4], 0  ;;  %s18_s14 = sshll.u32 %s485_s0, 4  ;;  %s28_s17 = sshll.u32 %s486_s1, 4  ;;  %s19_s14 = int_to_ptr.vmem [resolvable:$true] %s18_s14  ;;  %s29_s17 = int_to_ptr.vmem [resolvable:$true] %s28_s17 }
   0x4   :  { %s250_s18 = scalar_lea.vmem %s19_s14, 64  ;;  %p255_p1 = scmp.lt.s32.totalorder %s19_s14, %s19_s14 }
   0x5   :  { %p251_p0 = scmp.ne.s32.totalorder %s19_s14, %s250_s18  ;;  %p256_p2 = scmp.lt.s32.totalorder %s250_s18, %s250_s18 }
   0x7   :  { %p257_p3 = por %p256_p2, %p255_p1 }
   0x9   :  { %p258_p4 = pnand %p257_p3, %p251_p0 }
   0xb   :  { %261 = shalt.err (!%p258_p4)
}
   0xc   :  { %s326_s19 = smov [#allocation2]   ;;  %s262_s20 = scalar_lea.vmem %s29_s17, 64 }
   0xd   :  { %21 = dma.vmem_to_smem %s19_s14, 64, %s326_s19, [#allocation5]  }
   0xe   :  { %p263_p5 = scmp.ne.s32.totalorder %s29_s17, %s262_s20  ;;  %p267_p6 = scmp.lt.s32.totalorder %s29_s17, %s29_s17 }
   0xf   :  { %p268_p7 = scmp.lt.s32.totalorder %s262_s20, %s262_s20 }
  0x11   :  { %p269_p8 = por %p268_p7, %p267_p6 }
  0x13   :  { %p270_p9 = pnand %p269_p8, %p263_p5 }
  0x15   :  { %273 = shalt.err (!%p270_p9)
}
  0x16   :  { %s327_s0 = smov [#allocation6]   ;;  %s328_s1 = smov [#allocation8]  }
  0x17   :  { %31 = dma.vmem_to_smem %s29_s17, 64, %s327_s0, [#allocation7]  }
  0x18   :  { %s38_s21 = sshll.u32 %s328_s1, 4  ;;  %s274_s24 = scalar_lea.hbm %s487_s2, 64  ;;  %s39_s21 = int_to_ptr.vmem [resolvable:$true] %s38_s21 }
  0x19   :  { %p275_p10 = scmp.ne.s32.totalorder %s487_s2, %s274_s24  ;;  %p278_p11 = scmp.lt.u32.totalorder %s274_s24, %s487_s2 }
  0x1b   :  { %p280_p12 = pnand %p278_p11, %p275_p10 }
  0x1d   :  { %283 = shalt.err (!%p280_p12)
}
  0x1e   :  { %s284_s29 = scalar_lea.vmem %s39_s21, 64  ;;  %p289_p0 = scmp.lt.s32.totalorder %s39_s21, %s39_s21 }
  0x1f   :  { %p285_p13 = scmp.ne.s32.totalorder %s39_s21, %s284_s29  ;;  %p290_p1 = scmp.lt.s32.totalorder %s284_s29, %s284_s29 }
  0x21   :  { %p291_p2 = por %p290_p1, %p289_p0 }
  0x23   :  { %p292_p3 = pnand %p291_p2, %p285_p13 }
  0x25   :  { %295 = shalt.err (!%p292_p3)
}
  0x26   :  { %41 = dma.hbm_to_vmem [thread:$0]  %s487_s2, 64, %s39_s21, [#allocation3]  }
  0x27   :  { %318 = dma.done.wait [#allocation5], 64  }
  0x28   :  { %319 = vsyncadd [#allocation5], 4294967232 }
  0x29   :  { %320 = dma.done.wait [#allocation7], 64  }
  0x2a   :  { %321 = vsyncadd [#allocation7], 4294967232 }
  0x2b   :  { %322 = dma.done.wait [#allocation3], 64  }
  0x2c   :  { %323 = vsyncadd [#allocation3], 4294967232 }
  0x2d   :  { %51 = sfence }
  0x2e   :  { %s61_s5 = sld [smem:[#allocation2]]  ;;  %s208_s6 = sld [smem:[#allocation2 + $0x1]]  ;;  %v52_v0 = vld [vmem:[#allocation8] sm:$0x1]  ;;  %v53_v1 = vld [vmem:[#allocation8 + $0x1] sm:$0x1] }
  0x2f   :  { %s209_s7 = sld [smem:[#allocation2 + $0x2]]  ;;  %s210_s8 = sld [smem:[#allocation2 + $0x3]]  ;;  %v54_v2 = vld [vmem:[#allocation8 + $0x2] sm:$0x1]  ;;  %v374_v3 = vmul.f32 %v52_v0, %v52_v0  ;;  %v376_v4 = vmul.f32 %v53_v1, %v52_v0  ;;  %v384_v6 = vmul.f32 %v53_v1, %v53_v1 }
  0x30   :  { %s211_s9 = sld [smem:[#allocation2 + $0x4]]  ;;  %s368_s10 = sld [smem:[#allocation2 + $0x5]]  ;;  %v382_v5 = vmul.f32 %v54_v2, %v52_v0  ;;  %v394_v13 = vmul.f32 %v54_v2, %v53_v1  ;;  %v404_v18 = vmul.f32 %v54_v2, %v54_v2 }
  0x31   :  { %s370_s11 = sld [smem:[#allocation6]]  ;;  %s378_s12 = sld [smem:[#allocation2 + $0x81]] }
  0x32   :  { %s372_s2 = sld [smem:[#allocation2 + $0x80]]  ;;  %s380_s13 = sld [smem:[#allocation2 + $0x82]] }
  0x33   :  { %s386_s14 = sld [smem:[#allocation2 + $0x83]]  ;;  %s388_s15 = sld [smem:[#allocation2 + $0x84]] }
  0x34   :  { %v62_v7 = vstv %s61_s5  ;;  %v65_v8 = vstv %s208_s6  ;;  %s392_s16 = sld [smem:[#allocation2 + $0x85]]  ;;  %s397_s17 = sld [smem:[#allocation6 + $0x80]] }
  0x35   :  { %v63_v9 = vmul.f32 %v62_v7, %v374_v3  ;;  %v66_v10 = vmul.f32 %v65_v8, %v376_v4  ;;  %v69_v11 = vstv %s209_s7  ;;  %v73_v12 = vstv %s210_s8  ;;  %s400_s18 = sld [smem:[#allocation2 + $0x100]]  ;;  %s402_s19 = sld [smem:[#allocation2 + $0x101]] }
  0x36   :  { %v70_v14 = vmul.f32 %v69_v11, %v382_v5  ;;  %v77_v15 = vstv %s211_s9  ;;  %v74_v17 = vmul.f32 %v73_v12, %v384_v6  ;;  %v81_v20 = vstv %s368_s10  ;;  %s409_s20 = sld [smem:[#allocation2 + $0x102]]  ;;  %s411_s0 = sld [smem:[#allocation2 + $0x103]] }
  0x37   :  { %v67_v16 = vadd.f32 %v66_v10, %v63_v9  ;;  %v78_v19 = vmul.f32 %v77_v15, %v394_v13  ;;  %v99_v24 = vstv %s378_s12  ;;  %s416_s1 = sld [smem:[#allocation2 + $0x104]]  ;;  %s418_s21 = sld [smem:[#allocation2 + $0x105]]  ;;  %v82_v31 = vmul.f32 %v81_v20, %v404_v18 }
  0x38   :  { %v96_v21 = vstv %s372_s2  ;;  %v103_v25 = vstv %s380_s13  ;;  %v100_v26 = vmul.f32 %v99_v24, %v376_v4  ;;  %s424_s22 = sld [smem:[#allocation2 + $0x180]]  ;;  %s428_s23 = sld [smem:[#allocation2 + $0x181]]  ;;  %v85_v33 = vstv %s370_s11 }
  0x39   :  { %v71_v22 = vadd.f32 %v70_v14, %v67_v16  ;;  %v97_v23 = vmul.f32 %v96_v21, %v374_v3  ;;  %v104_v27 = vmul.f32 %v103_v25, %v382_v5  ;;  %v107_v28 = vstv %s386_s14  ;;  %s430_s24 = sld [smem:[#allocation2 + $0x182]]  ;;  %s435_s25 = sld [smem:[#allocation2 + $0x183]] }
  0x3a   :  { %v111_v29 = vstv %s388_s15  ;;  %v115_v32 = vstv %s392_s16  ;;  %v108_v35 = vmul.f32 %v107_v28, %v384_v6  ;;  %s440_s26 = sld [smem:[#allocation2 + $0x184]]  ;;  %s448_s27 = sld [smem:[#allocation6 + $0x100]]  ;;  %v119_v50 = vstv %s397_s17 }
  0x3b   :  { %v75_v30 = vadd.f32 %v74_v17, %v71_v22  ;;  %v101_v34 = vadd.f32 %v100_v26, %v97_v23  ;;  %v112_v36 = vmul.f32 %v111_v29, %v394_v13  ;;  %v116_v38 = vmul.f32 %v115_v32, %v404_v18  ;;  %s450_s28 = sld [smem:[#allocation2 + $0x185]]  ;;  %s459_s29 = sld [smem:[#allocation6 + $0x1]] }
  0x3c   :  { %v130_v39 = vstv %s400_s18  ;;  %v133_v40 = vstv %s402_s19  ;;  %v137_v44 = vstv %s409_s20  ;;  %v141_v47 = vstv %s411_s0  ;;  %s214_s30 = sld [smem:[#allocation6 + $0x2]]  ;;  %s237_s4 = sld [smem:[#allocation6 + $0x180]] }
  0x3d   :  { %v79_v37 = vadd.f32 %v78_v19, %v75_v30  ;;  %v105_v41 = vadd.f32 %v104_v27, %v101_v34  ;;  %v131_v42 = vmul.f32 %v130_v39, %v374_v3  ;;  %v134_v43 = vmul.f32 %v133_v40, %v376_v4  ;;  %s222_s5 = sld [smem:[#allocation6 + $0x81]]  ;;  %s223_s6 = sld [smem:[#allocation6 + $0x82]] }
  0x3e   :  { %v138_v46 = vmul.f32 %v137_v44, %v382_v5  ;;  %v145_v48 = vstv %s416_s1  ;;  %v142_v52 = vmul.f32 %v141_v47, %v384_v6  ;;  %v149_v55 = vstv %s418_s21  ;;  %s329_s7 = smov [#allocation9]  }
  0x3f   :  { %v83_v45 = vadd.f32 %v82_v31, %v79_v37  ;;  %v109_v49 = vadd.f32 %v108_v35, %v105_v41  ;;  %v135_v51 = vadd.f32 %v134_v43, %v131_v42  ;;  %v146_v54 = vmul.f32 %v145_v48, %v394_v13  ;;  %s197_s8 = sshll.u32 %s329_s7, 4  ;;  %s198_s8 = int_to_ptr.vmem [resolvable:$true] %s197_s8 }
  0x40   :  { %v161_v56 = vstv %s424_s22  ;;  %v150_v59 = vmul.f32 %v149_v55, %v404_v18  ;;  %v164_v61 = vstv %s428_s23  ;;  %v168_v62 = vstv %s430_s24  ;;  %s296_s9 = scalar_lea.vmem %s198_s8, 64  ;;  %p301_p5 = scmp.lt.s32.totalorder %s198_s8, %s198_s8 }
  0x41   :  { %v86_v53 = vadd.f32 %v85_v33, %v83_v45  ;;  %v113_v57 = vadd.f32 %v112_v36, %v109_v49  ;;  %v139_v58 = vadd.f32 %v138_v46, %v135_v51  ;;  %v162_v60 = vmul.f32 %v161_v56, %v374_v3  ;;  %p297_p4 = scmp.ne.s32.totalorder %s198_s8, %s296_s9  ;;  %p302_p6 = scmp.lt.s32.totalorder %s296_s9, %s296_s9 }
  0x42   :  { %v172_v63 = vstv %s435_s25  ;;  %v165_v2 = vmul.f32 %v164_v61, %v376_v4  ;;  %v169_v7 = vmul.f32 %v168_v62, %v382_v5  ;;  %v176_v8 = vstv %s440_s26 }
  0x43   :  { %242 = vtanh.f32 %v86_v53  ;;  %v117_v0 = vadd.f32 %v116_v38, %v113_v57  ;;  %v143_v1 = vadd.f32 %v142_v52, %v139_v58  ;;  %v173_v11 = vmul.f32 %v172_v63, %v384_v6  ;;  %p303_p7 = por %p302_p6, %p301_p5 }
  0x44   :  { %v166_v10 = vadd.f32 %v165_v2, %v162_v60  ;;  %v153_v12 = vstv %s448_s27  ;;  %v180_v14 = vstv %s450_s28  ;;  %v177_v17 = vmul.f32 %v176_v8, %v394_v13 }
  0x45   :  { %v120_v9 = vadd.f32 %v119_v50, %v117_v0  ;;  %v147_v3 = vadd.f32 %v146_v54, %v143_v1  ;;  %v181_v19 = vmul.f32 %v180_v14, %v404_v18  ;;  %v89_v20 = vstv %s459_s29  ;;  %p304_p8 = pnand %p303_p7, %p297_p4 }
  0x46   :  { %v170_v16 = vadd.f32 %v169_v7, %v166_v10  ;;  %v92_v24 = vstv %s214_s30  ;;  %v184_v25 = vstv %s237_s4  ;;  %v123_v29 = vstv %s222_s5 }
  0x47   :  { %244 = vtanh.f32 %v120_v9  ;;  %v151_v15 = vadd.f32 %v150_v59, %v147_v3  ;;  %v126_v13 = vstv %s223_s6 }
  0x48   :  { %v174_v5 = vadd.f32 %v173_v11, %v170_v16 }
  0x49   :  { %v154_v4 = vadd.f32 %v153_v12, %v151_v15 }
  0x4a   :  { %v178_v22 = vadd.f32 %v177_v17, %v174_v5 }
  0x4b   :  { %v155_v21 = vmax.f32 %v154_v4, -20.0 }
  0x4c   :  { %v182_v27 = vadd.f32 %v181_v19, %v178_v22 }
  0x4d   :  { %v243_v23 = vpop.eup %242  ;;  %v156_v26 = vmin.f32 %v155_v21, 2.0 }
  0x4e   :  { %v90_v6 = vmul.f32 %v243_v23, %v89_v20  ;;  %v185_v31 = vadd.f32 %v184_v25, %v182_v27 }
  0x4f   :  { %v157_v30 = vmul.f32 1.442695, %v156_v26 }
  0x50   :  { %v93_v28 = vadd.f32 %v92_v24, %v90_v6  ;;  %v186_v33 = vmax.f32 %v185_v31, -20.0 }
  0x51   :  { %v245_v32 = vpop.eup %244  ;;  %246 = vpow2.f32 %v157_v30 }
  0x52   :  { %94 = vst [vmem:[#allocation9] sm:$0x1] %v93_v28  ;;  %v124_v34 = vmul.f32 %v245_v32, %v123_v29  ;;  %v187_v18 = vmin.f32 %v186_v33, 2.0 }
  0x54   :  { %v127_v35 = vadd.f32 %v126_v13, %v124_v34  ;;  %v188_v36 = vmul.f32 1.442695, %v187_v18 }
  0x56   :  { %128 = vst [vmem:[#allocation9 + $0x1] sm:$0x1] %v127_v35  ;;  %248 = vpow2.f32 %v188_v36 }
  0x5b   :  { %v247_v37 = vpop.eup %246 }
  0x5c   :  { %159 = vst [vmem:[#allocation9 + $0x2] sm:$0x1] %v247_v37 }
  0x60   :  { %v249_v38 = vpop.eup %248 }
  0x61   :  { %190 = vst [vmem:[#allocation9 + $0x3] sm:$0x1] %v249_v38 }
  0x62   :  { %307 = shalt.err (!%p304_p8)
}
  0x63   :  { %s308_s2 = scalar_lea.hbm %s488_s3, 64 }
  0x64   :  { %p309_p9 = scmp.ne.s32.totalorder %s488_s3, %s308_s2  ;;  %p312_p10 = scmp.lt.u32.totalorder %s308_s2, %s488_s3 }
  0x66   :  { %p314_p11 = pnand %p312_p10, %p309_p9 }
  0x68   :  { %317 = shalt.err (!%p314_p11)
}
  0x69   :  { %200 = dma.vmem_to_hbm [thread:$0]  %s198_s8, 64, %s488_s3, [#allocation4]  }
  0x6a   :  { %324 = dma.done.wait [#allocation4], 64  }
  0x6b   :  { %325 = vsyncadd [#allocation4], 4294967232 }
  0x6c   :  { %204 = vsyncpa [#allocation3], 1 }
  0x6d   :  { %205 = vsyncpa [#allocation4], 1 }
  0x6e   :  { %206 = vsyncpa [#allocation5], 1 }
  0x6f   :  { %207 = vsyncpa [#allocation7], 1 }

</bundles_post_ra>
